<compile_context>
chip_gen: v6e
topology: v6e:2x2x1
jax: 0.10.0
libtpu: 0.0.40
codegen_flags: <defaults>
</compile_context>

<pallas_src>
import functools

import jax
import jax.numpy as jnp
from jax.experimental import pallas as pl
from jax.experimental.pallas import tpu as pltpu


# ----------------------------------------------------------------------------
# Fused kernel (one grid step = one disconnected subgraph)
# ----------------------------------------------------------------------------
def st_block_kernel(a_ref, x_ref, *rest, num_gcn_layers):
    """Fused STBlock forward for one graph of the batch.

    a_ref:  [n, n]   bf16   normalized adjacency block of this graph
    x_ref:  [n, f_in*T] bf16 input features, layout [n, (f, t)]
    rest:   w1,b1,w2,b2,w3,b3  folded GCN block weights (bf16) / biases (f32),
            wc,bc              banded temporal-conv weight (bf16) / bias (f32),
            o_ref              output [n, out_lanes>=128] f32, layout [n, (o, t)]
    """
    o_ref = rest[-1]
    wb = rest[:-1]
    a = a_ref[...]                                   # bf16 MXU input
    h = x_ref[...]                                   # bf16 MXU input
    for i in range(num_gcn_layers):
        w = wb[2 * i][...]                           # bf16 block weight
        b = wb[2 * i + 1][...]                       # f32 bias row
        # spatial aggregation over nodes (all time steps at once)
        s = jnp.dot(a, h, preferred_element_type=jnp.float32)
        # per-time feature projection folded into one block-diagonal matmul
        h = jnp.dot(s.astype(jnp.bfloat16), w,
                    preferred_element_type=jnp.float32) + b
        if i < num_gcn_layers - 1:
            h = jnp.maximum(h, 0.0)                  # ReLU in f32 on the VPU
        h = h.astype(jnp.bfloat16)                   # next MXU input
    wc = wb[2 * num_gcn_layers][...]
    bc = wb[2 * num_gcn_layers + 1][...]
    # temporal conv (k=3, pad=1) as one banded matmul; output layout [n,(o,t)],
    # columns padded to a 128-lane-dense slab -> unmasked vst.
    o_ref[...] = jnp.dot(h, wc, preferred_element_type=jnp.float32) + bc


# ----------------------------------------------------------------------------
# Wrapper
# ----------------------------------------------------------------------------
def st_block_forward(a_blocks, temporal_features, gcn_blk_params, conv_wblk,
                     conv_bblk, f_out):
    """a_blocks: [B, n, n]; temporal_features: [N=B*n, f_in, T] -> [N, f_out, T]."""
    B, n, _ = a_blocks.shape
    N, F_in, T = temporal_features.shape
    assert N == B * n
    x = temporal_features.reshape(N, F_in * T)       # free reshape, [N, (f, t)]

    # bf16 MXU inputs; biases stay f32 for VPU adds.
    a_bf = a_blocks.astype(jnp.bfloat16)
    x_bf = x.astype(jnp.bfloat16)
    flat_wb = []
    for w, b in gcn_blk_params:
        flat_wb += [w.astype(jnp.bfloat16), b.astype(jnp.float32)]
    flat_wb += [conv_wblk.astype(jnp.bfloat16), conv_bblk.astype(jnp.float32)]

    out_lanes = conv_wblk.shape[1]                   # padded to >= 128
    num_layers = len(gcn_blk_params)
    kernel = functools.partial(st_block_kernel, num_gcn_layers=num_layers)

    in_specs = [
        # per-graph adjacency tile (block-diagonal structure: only the diagonal
        # block of this graph is ever DMA'd)
        pl.BlockSpec((None, n, n), lambda g: (g, 0, 0)),
        # per-graph feature rows
        pl.BlockSpec((n, F_in * T), lambda g: (g, 0)),
    ]
    # weights / biases: constant block index -> loaded once, VMEM-resident
    in_specs += [pl.BlockSpec(t.shape, lambda g: (0, 0)) for t in flat_wb]
    out_spec = pl.BlockSpec((n, out_lanes), lambda g: (g, 0))

    # Advisory cost estimate so XLA schedules around the custom call.
    flops = 0
    for w in flat_wb[0:2 * num_layers:2]:
        flops += 2 * n * n * w.shape[0]              # A @ h
        flops += 2 * n * w.shape[0] * w.shape[1]     # h @ W_blk
    flops += 2 * n * flat_wb[-2].shape[0] * flat_wb[-2].shape[1]
    flops *= B
    bytes_accessed = sum(int(t.size) * t.dtype.itemsize
                         for t in (a_bf, x_bf, *flat_wb)) + N * out_lanes * 4

    y = pl.pallas_call(
        kernel,
        out_shape=jax.ShapeDtypeStruct((N, out_lanes), jnp.float32),
        grid=(B,),
        in_specs=in_specs,
        out_specs=out_spec,
        compiler_params=pltpu.CompilerParams(
            dimension_semantics=("parallel",),
            vmem_limit_bytes=32 * 1024 * 1024),
        cost_estimate=pl.CostEstimate(flops=int(flops), transcendentals=0,
                                      bytes_accessed=int(bytes_accessed)),
    )(a_bf, x_bf, *flat_wb)

    # strip the lane padding (free slice + reshape on the host side)
    return y[:, :f_out * T].reshape(N, f_out, T)


# ----------------------------------------------------------------------------
# Host-side construction of the block weights (pure layout algebra, done once)
# ----------------------------------------------------------------------------
def build_block_weights(gcn_params, conv_w, conv_b, t_in, min_out_lanes=128):
    """Fold per-time-step weights into single block matrices (padded for TPU).

    gcn_params: list of (W[Fi,Fo], b[Fo])
    conv_w:     [f_out, f_out, 3]  (out_ch, in_ch, k)  -- PyTorch Conv1d layout
    conv_b:     [f_out]
    """
    T = t_in
    eyeT = jnp.eye(T, dtype=jnp.float32)

    def round_up(v, m):
        return -(-v // m) * m

    # Zero-pad every GCN layer's output feature dim to a multiple of 8.
    padded = []
    fi_pad = gcn_params[0][0].shape[0]               # layer-1 input = f_in (data layout)
    fi_true = fi_pad
    for (w, b) in gcn_params:
        fi, fo = w.shape
        fo_pad = round_up(fo, 8)
        w_p = jnp.zeros((fi_pad, fo_pad), jnp.float32).at[:fi_true, :fo].set(w)
        b_p = jnp.zeros((fo_pad,), jnp.float32).at[:fo].set(b)
        padded.append((w_p, b_p))
        fi_pad, fi_true = fo_pad, fo

    blk_params = []
    # Layer 1: input layout [N, (f, t)] -> output layout [N, (t, o)]
    w1, b1 = padded[0]
    F0, H1 = w1.shape
    w1blk = jnp.einsum("fo,tu->ftuo", w1, eyeT).reshape(F0 * T, T * H1)
    b1blk = jnp.tile(b1, T).reshape(1, T * H1)
    blk_params.append((w1blk, b1blk))

    # Remaining layers: [N, (t, f)] -> [N, (t, o)]
    for w, b in padded[1:]:
        Fo = w.shape[1]
        blk_params.append((jnp.kron(eyeT, w), jnp.tile(b, T).reshape(1, T * Fo)))

    # Temporal conv (k=3, pad=1): input [N, (t, c)] -> output [N, (o, t)];
    # output columns zero-padded up to a multiple of 128 lanes.
    O, C, K = conv_w.shape
    C_pad = padded[-1][0].shape[1]
    conv_w_p = jnp.zeros((O, C_pad, K), jnp.float32).at[:, :C, :].set(conv_w)
    S = jnp.zeros((K, T, T), jnp.float32)
    for k in range(K):
        for t in range(T):
            tp = t + k - (K // 2)                    # padding = K // 2 = 1
            if 0 <= tp < T:
                S = S.at[k, tp, t].set(1.0)
    wconv = jnp.einsum("ock,kpt->pcot", conv_w_p, S).reshape(T * C_pad, O * T)
    bconv = jnp.repeat(conv_b, T).reshape(1, O * T)
    out_lanes = max(min_out_lanes, round_up(O * T, 128))
    wconv = jnp.pad(wconv, ((0, 0), (0, out_lanes - O * T)))
    bconv = jnp.pad(bconv, ((0, 0), (0, out_lanes - O * T)))
    return blk_params, wconv, bconv


# ----------------------------------------------------------------------------
# Parameter / graph construction (deterministic, synthetic)
# ----------------------------------------------------------------------------
def init_params(key, f_in, f_out):
    h1 = (f_in * 3 + f_out * 1) // 4
    h2 = (f_in * 0 + f_out * 4) // 4
    dims = [f_in, h1, h2, f_out]
    gcn_params = []
    for i in range(3):
        key, kw = jax.random.split(key)
        fan_in, fan_out = dims[i], dims[i + 1]
        scale = float(jnp.sqrt(6.0 / (fan_in + fan_out)))
        w = jax.random.uniform(kw, (fan_in, fan_out), jnp.float32, -scale, scale)
        b = jnp.zeros((fan_out,), jnp.float32)
        gcn_params.append((w, b))
    key, kw, kb = jax.random.split(key, 3)
    conv_w = jax.random.uniform(kw, (f_out, f_out, 3), jnp.float32, -0.3, 0.3)
    conv_b = jax.random.uniform(kb, (f_out,), jnp.float32, -0.3, 0.3)
    return gcn_params, conv_w, conv_b


def build_batched_graph(batch_size, nodes_per_graph):
    """Block-diagonal symmetric ring graphs + symmetric normalization."""
    n = batch_size * nodes_per_graph
    src, dst = [], []
    for b in range(batch_size):
        off = b * nodes_per_graph
        for i in range(nodes_per_graph):
            j = (i + 1) % nodes_per_graph
            src += [off + i, off + j]
            dst += [off + j, off + i]
    A = jnp.zeros((n, n), jnp.float32).at[jnp.array(src), jnp.array(dst)].set(1.0)
    deg = A.sum(axis=1)
    dinv = 1.0 / jnp.sqrt(jnp.maximum(deg, 1.0))
    return A * dinv[:, None] * dinv[None, :]


# ----------------------------------------------------------------------------
# Pure-JAX reference for verification (f32, dense adjacency)
# ----------------------------------------------------------------------------
def reference_forward(a_norm, temporal_features, gcn_params, conv_w, conv_b):
    h = jnp.transpose(temporal_features, (0, 2, 1))      # [N, T, f_in]
    for i, (w, b) in enumerate(gcn_params):
        h = jnp.einsum("nm,mtf->ntf", a_norm, h) @ w + b
        if i < len(gcn_params) - 1:
            h = jnp.maximum(h, 0.0)
    T = h.shape[1]
    hp = jnp.pad(h, ((0, 0), (1, 1), (0, 0)))
    y = sum(jnp.einsum("ntc,co->nto", hp[:, k:k + T, :], conv_w[:, :, k].T)
            for k in range(3)) + conv_b
    return jnp.transpose(y, (0, 2, 1))                   # [N, f_out, T]


# ----------------------------------------------------------------------------
# Main
# ----------------------------------------------------------------------------
if __name__ == "__main__":
    batch_size, nodes_per_graph = 2, 16
    node_num = batch_size * nodes_per_graph              # 32
    f_in, f_out, t_in = 4, 8, 8

    key = jax.random.PRNGKey(0)
    key, kx = jax.random.split(key)
    temporal_features = jax.random.normal(kx, (node_num, f_in, t_in), jnp.float32)

    a_norm = build_batched_graph(batch_size, nodes_per_graph)
    # Per-graph diagonal blocks of the (block-diagonal) normalized adjacency.
    a_blocks = jnp.stack([
        a_norm[b * nodes_per_graph:(b + 1) * nodes_per_graph,
               b * nodes_per_graph:(b + 1) * nodes_per_graph]
        for b in range(batch_size)])

    gcn_params, conv_w, conv_b = init_params(key, f_in, f_out)
    gcn_blk_params, conv_wblk, conv_bblk = build_block_weights(
        gcn_params, conv_w, conv_b, t_in)

    out = st_block_forward(a_blocks, temporal_features, gcn_blk_params,
                           conv_wblk, conv_bblk, f_out)
    out = jax.block_until_ready(out)

    ref = reference_forward(a_norm, temporal_features, gcn_params, conv_w, conv_b)
    assert out.shape == (node_num, f_out, t_in), out.shape
    # bf16 MXU inputs with f32 accumulation -> loosened tolerance vs f32 ref.
    assert jnp.allclose(out, ref, atol=5e-2, rtol=5e-2), \
        float(jnp.max(jnp.abs(out - ref)))

    print("KERNEL_OK")
</pallas_src>

<mosaic_0001>
module attributes {stable_mosaic.version = 11 : i64} {
  func.func @st_block_kernel(%arg0: i32, %arg1: memref<1x16x16xbf16, #tpu.memory_space<vmem>>, %arg2: memref<16x32xbf16, #tpu.memory_space<vmem>>, %arg3: memref<32x64xbf16, #tpu.memory_space<vmem>>, %arg4: memref<1x64xf32, #tpu.memory_space<vmem>>, %arg5: memref<64x64xbf16, #tpu.memory_space<vmem>>, %arg6: memref<1x64xf32, #tpu.memory_space<vmem>>, %arg7: memref<64x64xbf16, #tpu.memory_space<vmem>>, %arg8: memref<1x64xf32, #tpu.memory_space<vmem>>, %arg9: memref<64x128xbf16, #tpu.memory_space<vmem>>, %arg10: memref<1x128xf32, #tpu.memory_space<vmem>>, %arg11: memref<16x128xf32, #tpu.memory_space<vmem>>) attributes {dimension_semantics = [#tpu.dimension_semantics<parallel>], iteration_bounds = array<i64: 2>, scalar_prefetch = 0 : i64, scratch_operands = 0 : i64, tpu.core_type = #tpu.core_type<tc>, window_params = [{transform_indices = @transform_0, window_bounds = array<i64: 1, 16, 16>}, {transform_indices = @transform_1, window_bounds = array<i64: 16, 32>}, {pipeline_mode = #tpu.pipeline_mode<synchronous>, transform_indices = @transform_2, window_bounds = array<i64: 32, 64>}, {pipeline_mode = #tpu.pipeline_mode<synchronous>, transform_indices = @transform_3, window_bounds = array<i64: 1, 64>}, {pipeline_mode = #tpu.pipeline_mode<synchronous>, transform_indices = @transform_4, window_bounds = array<i64: 64, 64>}, {pipeline_mode = #tpu.pipeline_mode<synchronous>, transform_indices = @transform_5, window_bounds = array<i64: 1, 64>}, {pipeline_mode = #tpu.pipeline_mode<synchronous>, transform_indices = @transform_6, window_bounds = array<i64: 64, 64>}, {pipeline_mode = #tpu.pipeline_mode<synchronous>, transform_indices = @transform_7, window_bounds = array<i64: 1, 64>}, {pipeline_mode = #tpu.pipeline_mode<synchronous>, transform_indices = @transform_8, window_bounds = array<i64: 64, 128>}, {pipeline_mode = #tpu.pipeline_mode<synchronous>, transform_indices = @transform_9, window_bounds = array<i64: 1, 128>}, {transform_indices = @transform_10, window_bounds = array<i64: 16, 128>}]} {
    %c0 = arith.constant 0 : index
    %c0_0 = arith.constant 0 : index
    %c0_1 = arith.constant 0 : index
    %0 = vector.load %arg1[%c0, %c0_0, %c0_1] : memref<1x16x16xbf16, #tpu.memory_space<vmem>>, vector<1x16x16xbf16>
    %1 = vector.shape_cast %0 : vector<1x16x16xbf16> to vector<16x16xbf16>
    %c0_2 = arith.constant 0 : index
    %c0_3 = arith.constant 0 : index
    %2 = vector.load %arg2[%c0_2, %c0_3] : memref<16x32xbf16, #tpu.memory_space<vmem>>, vector<16x32xbf16>
    %c0_4 = arith.constant 0 : index
    %c0_5 = arith.constant 0 : index
    %3 = vector.load %arg3[%c0_4, %c0_5] : memref<32x64xbf16, #tpu.memory_space<vmem>>, vector<32x64xbf16>
    %c0_6 = arith.constant 0 : index
    %c0_7 = arith.constant 0 : index
    %4 = vector.load %arg4[%c0_6, %c0_7] : memref<1x64xf32, #tpu.memory_space<vmem>>, vector<1x64xf32>
    %cst = arith.constant dense<0.000000e+00> : vector<16x32xf32>
    %5 = tpu.matmul %1, %2, %cst {dimension_numbers = #tpu.dot_dimension_numbers<[1], [0], [0], [1], [0, 0, 1, 1], [], []>} : vector<16x16xbf16>, vector<16x32xbf16>, vector<16x32xf32> -> vector<16x32xf32>
    %6 = arith.truncf %5 : vector<16x32xf32> to vector<16x32xbf16>
    %cst_8 = arith.constant dense<0.000000e+00> : vector<16x64xf32>
    %7 = tpu.matmul %6, %3, %cst_8 {dimension_numbers = #tpu.dot_dimension_numbers<[1], [0], [0], [1], [0, 0, 1, 1], [], []>} : vector<16x32xbf16>, vector<32x64xbf16>, vector<16x64xf32> -> vector<16x64xf32>
    %8 = vector.broadcast %4 : vector<1x64xf32> to vector<16x64xf32>
    %9 = arith.addf %7, %8 : vector<16x64xf32>
    %cst_9 = arith.constant 0.000000e+00 : f32
    %10 = vector.broadcast %cst_9 : f32 to vector<16x64xf32>
    %11 = arith.maximumf %9, %10 : vector<16x64xf32>
    %12 = arith.truncf %11 : vector<16x64xf32> to vector<16x64xbf16>
    %c0_10 = arith.constant 0 : index
    %c0_11 = arith.constant 0 : index
    %13 = vector.load %arg5[%c0_10, %c0_11] : memref<64x64xbf16, #tpu.memory_space<vmem>>, vector<64x64xbf16>
    %c0_12 = arith.constant 0 : index
    %c0_13 = arith.constant 0 : index
    %14 = vector.load %arg6[%c0_12, %c0_13] : memref<1x64xf32, #tpu.memory_space<vmem>>, vector<1x64xf32>
    %cst_14 = arith.constant dense<0.000000e+00> : vector<16x64xf32>
    %15 = tpu.matmul %1, %12, %cst_14 {dimension_numbers = #tpu.dot_dimension_numbers<[1], [0], [0], [1], [0, 0, 1, 1], [], []>} : vector<16x16xbf16>, vector<16x64xbf16>, vector<16x64xf32> -> vector<16x64xf32>
    %16 = arith.truncf %15 : vector<16x64xf32> to vector<16x64xbf16>
    %cst_15 = arith.constant dense<0.000000e+00> : vector<16x64xf32>
    %17 = tpu.matmul %16, %13, %cst_15 {dimension_numbers = #tpu.dot_dimension_numbers<[1], [0], [0], [1], [0, 0, 1, 1], [], []>} : vector<16x64xbf16>, vector<64x64xbf16>, vector<16x64xf32> -> vector<16x64xf32>
    %18 = vector.broadcast %14 : vector<1x64xf32> to vector<16x64xf32>
    %19 = arith.addf %17, %18 : vector<16x64xf32>
    %cst_16 = arith.constant 0.000000e+00 : f32
    %20 = vector.broadcast %cst_16 : f32 to vector<16x64xf32>
    %21 = arith.maximumf %19, %20 : vector<16x64xf32>
    %22 = arith.truncf %21 : vector<16x64xf32> to vector<16x64xbf16>
    %c0_17 = arith.constant 0 : index
    %c0_18 = arith.constant 0 : index
    %23 = vector.load %arg7[%c0_17, %c0_18] : memref<64x64xbf16, #tpu.memory_space<vmem>>, vector<64x64xbf16>
    %c0_19 = arith.constant 0 : index
    %c0_20 = arith.constant 0 : index
    %24 = vector.load %arg8[%c0_19, %c0_20] : memref<1x64xf32, #tpu.memory_space<vmem>>, vector<1x64xf32>
    %cst_21 = arith.constant dense<0.000000e+00> : vector<16x64xf32>
    %25 = tpu.matmul %1, %22, %cst_21 {dimension_numbers = #tpu.dot_dimension_numbers<[1], [0], [0], [1], [0, 0, 1, 1], [], []>} : vector<16x16xbf16>, vector<16x64xbf16>, vector<16x64xf32> -> vector<16x64xf32>
    %26 = arith.truncf %25 : vector<16x64xf32> to vector<16x64xbf16>
    %cst_22 = arith.constant dense<0.000000e+00> : vector<16x64xf32>
    %27 = tpu.matmul %26, %23, %cst_22 {dimension_numbers = #tpu.dot_dimension_numbers<[1], [0], [0], [1], [0, 0, 1, 1], [], []>} : vector<16x64xbf16>, vector<64x64xbf16>, vector<16x64xf32> -> vector<16x64xf32>
    %28 = vector.broadcast %24 : vector<1x64xf32> to vector<16x64xf32>
    %29 = arith.addf %27, %28 : vector<16x64xf32>
    %30 = arith.truncf %29 : vector<16x64xf32> to vector<16x64xbf16>
    %c0_23 = arith.constant 0 : index
    %c0_24 = arith.constant 0 : index
    %31 = vector.load %arg9[%c0_23, %c0_24] : memref<64x128xbf16, #tpu.memory_space<vmem>>, vector<64x128xbf16>
    %c0_25 = arith.constant 0 : index
    %c0_26 = arith.constant 0 : index
    %32 = vector.load %arg10[%c0_25, %c0_26] : memref<1x128xf32, #tpu.memory_space<vmem>>, vector<1x128xf32>
    %cst_27 = arith.constant dense<0.000000e+00> : vector<16x128xf32>
    %33 = tpu.matmul %30, %31, %cst_27 {dimension_numbers = #tpu.dot_dimension_numbers<[1], [0], [0], [1], [0, 0, 1, 1], [], []>} : vector<16x64xbf16>, vector<64x128xbf16>, vector<16x128xf32> -> vector<16x128xf32>
    %34 = vector.broadcast %32 : vector<1x128xf32> to vector<16x128xf32>
    %35 = arith.addf %33, %34 : vector<16x128xf32>
    %c0_28 = arith.constant 0 : index
    %c0_29 = arith.constant 0 : index
    %36 = vector.load %arg11[%c0_28, %c0_29] : memref<16x128xf32, #tpu.memory_space<vmem>>, vector<16x128xf32>
    tpu.vector_store %arg11[%c0_28, %c0_29], %35 {strides = array<i32>} : memref<16x128xf32, #tpu.memory_space<vmem>>, vector<16x128xf32>,
    return
  }
  func.func @transform_0(%arg0: i32) -> (i32, i32, i32) {
    %c0_i32 = arith.constant 0 : i32
    %c0_i32_0 = arith.constant 0 : i32
    %c0_i32_1 = arith.constant 0 : i32
    return %arg0, %c0_i32, %c0_i32_0 : i32, i32, i32
  }
  func.func @transform_1(%arg0: i32) -> (i32, i32) {
    %c0_i32 = arith.constant 0 : i32
    %c0_i32_0 = arith.constant 0 : i32
    return %arg0, %c0_i32 : i32, i32
  }
  func.func @transform_2(%arg0: i32) -> (i32, i32) {
    %c0_i32 = arith.constant 0 : i32
    %c0_i32_0 = arith.constant 0 : i32
    %c0_i32_1 = arith.constant 0 : i32
    return %c0_i32, %c0_i32_0 : i32, i32
  }
  func.func @transform_3(%arg0: i32) -> (i32, i32) {
    %c0_i32 = arith.constant 0 : i32
    %c0_i32_0 = arith.constant 0 : i32
    %c0_i32_1 = arith.constant 0 : i32
    return %c0_i32, %c0_i32_0 : i32, i32
  }
  func.func @transform_4(%arg0: i32) -> (i32, i32) {
    %c0_i32 = arith.constant 0 : i32
    %c0_i32_0 = arith.constant 0 : i32
    %c0_i32_1 = arith.constant 0 : i32
    return %c0_i32, %c0_i32_0 : i32, i32
  }
  func.func @transform_5(%arg0: i32) -> (i32, i32) {
    %c0_i32 = arith.constant 0 : i32
    %c0_i32_0 = arith.constant 0 : i32
    %c0_i32_1 = arith.constant 0 : i32
    return %c0_i32, %c0_i32_0 : i32, i32
  }
  func.func @transform_6(%arg0: i32) -> (i32, i32) {
    %c0_i32 = arith.constant 0 : i32
    %c0_i32_0 = arith.constant 0 : i32
    %c0_i32_1 = arith.constant 0 : i32
    return %c0_i32, %c0_i32_0 : i32, i32
  }
  func.func @transform_7(%arg0: i32) -> (i32, i32) {
    %c0_i32 = arith.constant 0 : i32
    %c0_i32_0 = arith.constant 0 : i32
    %c0_i32_1 = arith.constant 0 : i32
    return %c0_i32, %c0_i32_0 : i32, i32
  }
  func.func @transform_8(%arg0: i32) -> (i32, i32) {
    %c0_i32 = arith.constant 0 : i32
    %c0_i32_0 = arith.constant 0 : i32
    %c0_i32_1 = arith.constant 0 : i32
    return %c0_i32, %c0_i32_0 : i32, i32
  }
  func.func @transform_9(%arg0: i32) -> (i32, i32) {
    %c0_i32 = arith.constant 0 : i32
    %c0_i32_0 = arith.constant 0 : i32
    %c0_i32_1 = arith.constant 0 : i32
    return %c0_i32, %c0_i32_0 : i32, i32
  }
  func.func @transform_10(%arg0: i32) -> (i32, i32) {
    %c0_i32 = arith.constant 0 : i32
    %c0_i32_0 = arith.constant 0 : i32
    return %arg0, %c0_i32 : i32, i32
  }
}

</mosaic_0001>

<bundles_post_ra>
// kernel: tpu_custom_call.1
= control target key start
LH: loop header
LB: loop body
LE: loop exit
PB: predicated region body
PF: predicated region fallthrough
CT: control target
= control target key end

     0   :  { %s1994_s0 = inlined_call_operand.hbm [shape: bf16[2,16,16], index: 0, kind: input, shape index: {}]   ;;  %s1995_s1 = inlined_call_operand.hbm [shape: bf16[32,32], index: 1, kind: input, shape index: {}]   ;;  %s1996_s2 = inlined_call_operand.hbm [shape: bf16[32,64], index: 2, kind: input, shape index: {}]   ;;  %s1997_s3 = inlined_call_operand.vmem [shape: f32[1,64], index: 3, kind: input, shape index: {}]   ;;  %s1998_s4 = inlined_call_operand.hbm [shape: bf16[64,64], index: 4, kind: input, shape index: {}]   ;;  %s1999_s5 = inlined_call_operand.vmem [shape: f32[1,64], index: 5, kind: input, shape index: {}]   ;;  %s2000_s6 = inlined_call_operand.hbm [shape: bf16[64,64], index: 6, kind: input, shape index: {}]   ;;  %s2001_s7 = inlined_call_operand.vmem [shape: f32[1,64], index: 7, kind: input, shape index: {}]   ;;  %s2002_s8 = inlined_call_operand.hbm [shape: bf16[64,128], index: 8, kind: input, shape index: {}]   ;;  %s2003_s9 = inlined_call_operand.vmem [shape: f32[1,128], index: 9, kind: input, shape index: {}]   ;;  %s2004_s10 = inlined_call_operand.hbm [shape: f32[32,128], index: 10, kind: output, shape index: {}]  }
   0x1   :  { %2013 = sst [smem:[#allocation22_spill]] %s1994_s0 }
   0x2   :  { %2014 = sst [smem:[#allocation23_spill]] %s1996_s2 }
   0x3   :  { %2015 = sst [smem:[#allocation24_spill]] %s1998_s4 }
   0x4   :  { %2016 = sst [smem:[#allocation25_spill]] %s2000_s6 }
   0x5   :  { %2017 = sst [smem:[#allocation26_spill]] %s2002_s8 }
   0x6   :  { %15 = vsyncpa [#allocation3], 0 }
   0x7   :  { %17 = vsyncpa [#allocation3 + $0x1], 0 }
   0x8   :  { %18 = vsyncpa [#allocation6], 0 }
   0x9   :  { %20 = vsyncpa [#allocation6 + $0x1], 0 }
   0xa   :  { %21 = vsyncpa [#allocation9], 0 }
   0xb   :  { %22 = vsyncpa [#allocation12], 0 }
   0xc   :  { %23 = vsyncpa [#allocation4], 0 }
   0xd   :  { %25 = vsyncpa [#allocation4 + $0x1], 0  ;;  %s1665_s13 = smov 0   ;;  %s1667_s14 = smov 0  }
   0xe   :  { %s1669_s15 = smov 0   ;;  %s1671_s16 = smov 0  }
   0xf LB: > { %2018 = sst [smem:[#allocation20_spill]] %s1591_s15  ;;  %s1686_s17 = sadd.s32 4294967295, %s1595_s16   ;;  %s1595_s16 = sphi %s1671_s16, %s2048_s16   ;;  %s1591_s15 = sphi %s1669_s15, %s2047_s15   ;;  %s1587_s14 = sphi %s1667_s14, %s2046_s14   ;;  %s1583_s13 = sphi %s1665_s13, %s2045_s13  }
  0x10   : > { %s1099_s18 = sadd.s32 4294967294, %s1595_s16   ;;  %p51_p0 = scmp.ne.s32.totalorder %s1587_s14, %s1583_s13 }
  0x11   : > { %p2005_p1 = scmp.eq.s32.totalorder %s1686_s17, 0  ;;  %p269_p2 = scmp.eq.s32.totalorder %s1686_s17, 1 }
  0x12   : > { %p275_p3 = scmp.eq.s32.totalorder %s1099_s18, 1  ;;  %p1100_p5 = scmp.ge.s32.totalorder %s1595_s16, 1 }
  0x13   : > { %p1695_p4 = por %p2005_p1, %p51_p0  ;;  %p282_p7 = scmp.lt.s32.totalorder %s1595_s16, 3 }
  0x14   : > { %p1700_p6 = por %p275_p3, %p51_p0  ;;  %s1597_s22 = smov [#allocation7]  }
  0x15   : > { %s2019_s19 = scalar_select %p1695_p4, 1, 0 }
  0x16   : > { %s2020_s20 = scalar_select %p1700_p6, 1, 0 }
  0x17   : > { %p1705_p8 = pnand %p1100_p5, %p282_p7  ;;  %s294_s23 = sshll.u32 %s1597_s22, 4  ;;  %s295_s23 = int_to_ptr.vmem [resolvable:$true] %s294_s23 }
  0x18   : > { %s1598_s25 = smov [#allocation8]   ;;  %s1599_s27 = smov [#allocation10]  }
  0x19   : > { %p1263_p9 = pneg %p1705_p8  ;;  %s310_s26 = sshll.u32 %s1598_s25, 4  ;;  %s311_s26 = int_to_ptr.vmem [resolvable:$true] %s310_s26 }
  0x1a   : > { %s326_s28 = sshll.u32 %s1599_s27, 4  ;;  %s1366_s29 = scalar_lea.vmem %s295_s23, 256  ;;  %s327_s28 = int_to_ptr.vmem [resolvable:$true] %s326_s28 }
  0x1b   : > { %p1714_p11 = pnand %p1263_p9, %p2005_p1  ;;  %p1367_p13 = scmp.ne.s32.totalorder %s295_s23, %s1366_s29 }
  0x1c   : > { %p1374_p5 = scmp.lt.s32.totalorder %s295_s23, %s295_s23  ;;  %p1375_p7 = scmp.lt.s32.totalorder %s1366_s29, %s1366_s29 }
  0x1d   : > { %p1357_p12 = pneg %p1714_p11 }
  0x1e   : > { %p1376_p9 = por %p1375_p7, %p1374_p5 }
  0x1f   : > { %p1369_p0 = pnand %p1367_p13, %p1357_p12 }
  0x21   : > { %p1370_p3 = pneg %p1369_p0 }
  0x23   : > { %p1377_p10 = pnand %p1376_p9, %p1370_p3 }
  0x25   : > { %1380 = shalt.err (!%p1377_p10)
}
  0x26   : > { %s2006_s30 = smov 64   ;;  %s2008_s11 = smov 4  }
  0x27   : > { %s2023_s2 = sld [smem:[#allocation23_spill]]  ;;  %s1392_s22 = scalar_lea.vmem %s311_s26, 512 }
  0x28   : > { %p1393_p13 = scmp.ne.s32.totalorder %s311_s26, %s1392_s22  ;;  %p1400_p3 = scmp.lt.s32.totalorder %s311_s26, %s311_s26 }
  0x29   : > { %p1401_p10 = scmp.lt.s32.totalorder %s1392_s22, %s1392_s22 }
  0x2a   : > { %p1395_p0 = pnand %p1393_p13, %p1357_p12 }
  0x2b   : > { %p1402_p7 = por %p1401_p10, %p1400_p3 }
  0x2c   : > { %p1396_p5 = pneg %p1395_p0 }
  0x2d   : > { %1266 = dma.hbm_to_vmem [thread:$0]  (!%p1714_p11), %s2023_s2, 256, %s295_s23, [#allocation6], %s2006_s30, %s2006_s30, %s2008_s11  }
  0x2e   : > { %p1403_p9 = pnand %p1402_p7, %p1396_p5 }
  0x30   : > { %1406 = shalt.err (!%p1403_p9)
}
  0x31   : > { %s2024_s4 = sld [smem:[#allocation24_spill]]  ;;  %s1418_s23 = scalar_lea.vmem %s327_s28, 512 }
  0x32   : > { %p1419_p1 = scmp.ne.s32.totalorder %s327_s28, %s1418_s23  ;;  %p1426_p3 = scmp.lt.s32.totalorder %s327_s28, %s327_s28 }
  0x33   : > { %p1427_p5 = scmp.lt.s32.totalorder %s1418_s23, %s1418_s23 }
  0x34   : > { %p1421_p13 = pnand %p1419_p1, %p1357_p12 }
  0x35   : > { %p1428_p10 = por %p1427_p5, %p1426_p3 }
  0x36   : > { %p1422_p0 = pneg %p1421_p13 }
  0x37   : > { %1269 = dma.hbm_to_vmem [thread:$0]  (!%p1714_p11), %s2024_s4, 512, %s311_s26, [#allocation9], %s2006_s30, %s2006_s30, %s2008_s11  }
  0x38   : > { %p1429_p7 = pnand %p1428_p10, %p1422_p0 }
  0x3a   : > { %1432 = shalt.err (!%p1429_p7)
}
  0x3b   : > { %s2025_s6 = sld [smem:[#allocation25_spill]]  ;;  %s1602_s26 = smov [#allocation11]  }
  0x3c   : > { %s342_s18 = sshll.u32 %s1602_s26, 4  ;;  %s343_s18 = int_to_ptr.vmem [resolvable:$true] %s342_s18 }
  0x3d   : > { %s1444_s22 = scalar_lea.vmem %s343_s18, 512  ;;  %p1452_p0 = scmp.lt.s32.totalorder %s343_s18, %s343_s18 }
  0x3e   : > { %p1445_p1 = scmp.ne.s32.totalorder %s343_s18, %s1444_s22  ;;  %p1453_p3 = scmp.lt.s32.totalorder %s1444_s22, %s1444_s22 }
  0x40   : > { %p1447_p9 = pnand %p1445_p1, %p1357_p12  ;;  %p1454_p5 = por %p1453_p3, %p1452_p0 }
  0x41   : > { %1272 = dma.hbm_to_vmem [thread:$0]  (!%p1714_p11), %s2025_s6, 512, %s327_s28, [#allocation9], %s2006_s30, %s2006_s30, %s2008_s11  }
  0x42   : > { %p1448_p13 = pneg %p1447_p9 }
  0x44   : > { %p1455_p10 = pnand %p1454_p5, %p1448_p13 }
  0x46   : > { %1458 = shalt.err (!%p1455_p10)
}
  0x47   : > { %s2026_s8 = sld [smem:[#allocation26_spill]]  ;;  %s1765_s27 = sadd.s32 1, %s1595_s16  }
  0x48   : > { %s38_s24 = sadd.s32 1, %s1591_s15  ;;  %s35_s23 = ssub.s32 %s1595_s16, %s1765_s27 }
  0x49   : > { %p45_p12 = scmp.ne.s32.totalorder %s1591_s15, %s1587_s14  ;;  %p36_p7 = scmp.eq.s32.totalorder %s35_s23, 0 }
  0x4a   : > { %p46_p1 = scmp.eq.s32.totalorder %s1595_s16, 0  ;;  %p1291_p13 = scmp.lt.s32.totalorder %s1595_s16, 2 }
  0x4b   : > { %p1775_p9 = por %p269_p2, %p45_p12  ;;  %s359_s26 = sand.u32 1, %s1591_s15  }
  0x4c   : > { %s1781_s12 = scalar_select %p36_p7, %s1591_s15, %s38_s24  }
  0x4d   : > { %1275 = dma.hbm_to_vmem [thread:$0]  (!%p1714_p11), %s2026_s8, 512, %s343_s18, [#allocation12], %s2006_s30, %s2006_s30, %s2008_s11  }
  0x4e   : > { %s2027_s29 = scalar_select %p1775_p9, 1, 0 }
  0x4f   : > { %2028 = sst [smem:[#allocation21_spill]] %s1781_s12  ;;  %p47_p0 = por %p46_p1, %p45_p12 }
  0x50   : > { %s1106_s22 = sshll.u32 %s359_s26, 3  ;;  %s1152_s18 = sshll.u32 %s1595_s16, 7 }
  0x51   : > { %s2029_s0 = sld [smem:[#allocation22_spill]]  ;;  %s363_s23 = scalar_lea.vmem [#allocation2], %s1106_s22 }
  0x52   : > { %s370_s11 = sshll.u32 %s363_s23, 4  ;;  %p1792_p2 = pnand %p1291_p13, %p47_p0  ;;  %s1790_s11 = int_to_ptr.vmem [resolvable:$true] %s370_s11 }
  0x53   : > { %s1799_s6 = scalar_lea.hbm %s1995_s1, %s1152_s18  ;;  %s384_s28 = scalar_lea.vmem [#allocation5], %s1106_s22 }
  0x54   : > { %s1801_s25 = sshll.u32 %s384_s28, 4  ;;  %s1803_s8 = scalar_lea.sflag [#allocation3], %s359_s26  ;;  %s1834_s25 = int_to_ptr.vmem [resolvable:$true] %s1801_s25 }
  0x55   : > { %p1461_p3 = pneg %p1792_p2 }
  0x57   : > { %s1788_s30 = scalar_lea.hbm %s2029_s0, %s1152_s18  ;;  %s1464_s4 = scalar_lea.hbm %s2029_s0, 256 }
  0x58   : > { %s1459_s12 = scalar_lea.hbm %s1788_s30, 128  ;;  %p1465_p12 = scmp.lt.s32.totalorder %s1788_s30, %s2029_s0 }
  0x59   : > { %p1460_p11 = scmp.ne.s32.totalorder %s1788_s30, %s1459_s12  ;;  %p1466_p7 = scmp.lt.s32.totalorder %s1464_s4, %s1459_s12 }
  0x5b   : > { %p1462_p5 = pnand %p1461_p3, %p1460_p11  ;;  %p1467_p1 = por %p1466_p7, %p1465_p12 }
  0x5d   : > { %p1463_p10 = pneg %p1462_p5 }
  0x5f   : > { %p1468_p13 = pnand %p1467_p1, %p1463_p10 }
  0x61   : > { %1471 = shalt.err (!%p1468_p13)
}
  0x62   : > { %s1472_s26 = scalar_lea.vmem %s1790_s11, 128  ;;  %s1603_s15 = smov [#allocation2]  }
  0x63   : > { %p1473_p0 = scmp.ne.s32.totalorder %s1790_s11, %s1472_s26  ;;  %s1477_s22 = sshll.u32 %s1603_s15, 4  ;;  %s1478_s22 = int_to_ptr.vmem [resolvable:$false] %s1477_s22 }
  0x64   : > { %s1479_s28 = scalar_lea.vmem %s1478_s22, 256  ;;  %p1480_p6 = scmp.lt.s32.totalorder %s1790_s11, %s1478_s22 }
  0x65   : > { %p1475_p11 = pnand %p1473_p0, %p1461_p3  ;;  %p1481_p9 = scmp.lt.s32.totalorder %s1479_s28, %s1472_s26 }
  0x67   : > { %p1476_p5 = pneg %p1475_p11  ;;  %p1482_p4 = por %p1481_p9, %p1480_p6 }
  0x69   : > { %p1483_p12 = pnand %p1482_p4, %p1476_p5 }
  0x6b   : > { %1486 = shalt.err (!%p1483_p12)
}
  0x6c   : > { %s2031_s12 = smov 4   ;;  %s2032_s23 = smov 64  }
  0x6d   : > { %1279 = dma.hbm_to_vmem [thread:$0]  (!%p1792_p2), %s1788_s30, 128, %s1790_s11, %s1803_s8, %s2032_s23, %s2032_s23, %s2031_s12  }
  0x6e   : > { %s380_s4 = sand.u32 1, %s1595_s16   ;;  %s1487_s18 = scalar_lea.hbm %s1799_s6, 128 }
  0x6f   : > { %s381_s24 = scalar_lea.sflag [#allocation6], %s380_s4  ;;  %p1488_p4 = scmp.ne.s32.totalorder %s1799_s6, %s1487_s18 }
  0x70   : > { %s1492_s22 = scalar_lea.hbm %s1995_s1, 256  ;;  %p1493_p10 = scmp.lt.s32.totalorder %s1799_s6, %s1995_s1 }
  0x71   : > { %p1490_p6 = pnand %p1488_p4, %p1461_p3  ;;  %p1494_p7 = scmp.lt.s32.totalorder %s1492_s22, %s1487_s18 }
  0x73   : > { %p1491_p9 = pneg %p1490_p6  ;;  %p1495_p1 = por %p1494_p7, %p1493_p10 }
  0x75   : > { %p1496_p13 = pnand %p1495_p1, %p1491_p9 }
  0x77   : > { %1499 = shalt.err (!%p1496_p13)
}
  0x78   : > { %s1500_s8 = scalar_lea.vmem %s1834_s25, 128  ;;  %s1604_s30 = smov [#allocation5]  }
  0x79   : > { %p1501_p0 = scmp.ne.s32.totalorder %s1834_s25, %s1500_s8  ;;  %s1505_s11 = sshll.u32 %s1604_s30, 4  ;;  %s1506_s11 = int_to_ptr.vmem [resolvable:$false] %s1505_s11 }
  0x7a   : > { %s1507_s4 = scalar_lea.vmem %s1506_s11, 256  ;;  %p1508_p12 = scmp.lt.s32.totalorder %s1834_s25, %s1506_s11 }
  0x7b   : > { %p1503_p11 = pnand %p1501_p0, %p1461_p3  ;;  %p1509_p4 = scmp.lt.s32.totalorder %s1507_s4, %s1500_s8 }
  0x7d   : > { %p1504_p5 = pneg %p1503_p11  ;;  %p1510_p6 = por %p1509_p4, %p1508_p12 }
  0x7f   : > { %p1511_p10 = pnand %p1510_p6, %p1504_p5 }
  0x81   : > { %1514 = shalt.err (!%p1511_p10)
}
  0x82   : > { %1282 = dma.hbm_to_vmem [thread:$0]  (!%p1792_p2), %s1799_s6, 128, %s1834_s25, %s381_s24, %s2032_s23, %s2032_s23, %s2031_s12  }
  0x83   : > { %403 = sbr.rel (%p1705_p8) target bundleno = 1579 (0x62b), region = 60  ;;  %s1865_s0 = sand.u32 (!%p1705_p8), 1, %s1587_s14  }
  0x84   : > { %s1113_s18 = sshll.u32 (!%p1705_p8), %s1865_s0, 3  ;;  %s406_s26 = scalar_lea.sflag (!%p1705_p8), [#allocation3], %s1865_s0 }
  0x85   : > { %s409_s15 = scalar_lea.vmem (!%p1705_p8), [#allocation2], %s1113_s18  ;;  %p2033_p3 = scmp.ne.s32.totalorder (!%p1705_p8), %s2019_s19, 0 }
  0x88   : > { %1558 = dma.done.wait (%p2033_p3), %s406_s26, 128  }
  0x89   : > { %1560 = vsyncadd (%p2033_p3), %s406_s26, 4294967168  ;;  %s414_s2 = sand.u32 1, %s1686_s17   ;;  %s418_s21 = scalar_lea.vmem [#allocation5], %s1113_s18 }
  0x8a   : > { %s415_s6 = scalar_lea.sflag [#allocation6], %s414_s2 }
  0x8b   : > { %1562 = dma.done.wait (%p2033_p3), %s415_s6, 128  }
  0x8c   : > { %1564 = vsyncadd (%p2033_p3), %s415_s6, 4294967168  ;;  %p2034_p8 = scmp.eq.s32.totalorder %s1686_s17, 0 }
  0x8e   : > { %1566 = dma.done.wait (%p2034_p8), [#allocation6], 256   ;;  %p2035_p2 = pmov %p2034_p8 }
  0x90   : > { %1568 = vsyncadd (%p2035_p2), [#allocation6], 4294967040  ;;  %p2036_p9 = pmov %p2035_p2 }
  0x91   : > { %p2037_p7 = pmov %p2035_p2 }
  0x92   : > { %1570 = dma.done.wait (%p2036_p9), [#allocation9], 1024  }
  0x93   : > { %1572 = vsyncadd (%p2037_p7), [#allocation9], 4294966272  ;;  %p2038_p1 = pmov %p2035_p2 }
  0x95   : > { %1574 = dma.done.wait (%p2038_p1), [#allocation12], 512   ;;  %p2039_p13 = pmov %p2038_p1 }
  0x96   : > { %v1605_v0 = vmov 0.0   ;;  %vm1606_vm0 = vmmov 0   ;;  %v1339_v1 = vld [vmem:[%s418_s21] sm:$0xff]   ;;  %v1896_v2 = vld [vmem:[%s409_s15] sm:$0xff]   ;;  %vm499_vm1 = vcmask 130048   ;;  %vm563_vm2 = vcmask 261120  }
  0x97   : > { %1576 = vsyncadd (%p2039_p13), [#allocation12], 4294966784  ;;  %1179 = vmatprep.subr.bf16.mxu0 %v1605_v0  ;;  %1181 = vmatprep.mubr.msk.bf16.mxu0 %vm1606_vm0, %v1605_v0  ;;  %v1341_v3 = vld [vmem:[#allocation7 + $0x8] sm:$0xff]   ;;  %v1342_v4 = vld [vmem:[#allocation7] sm:$0xff]   ;;  %vm692_vm3 = vcmask 523264   ;;  %s1119_s28 = sshll.u32 %s1865_s0, 4 }
  0x98   : > { %1185 = vmatprep.subr.bf16.mxu1 %v1605_v0  ;;  %1189 = vmatprep.mubr.msk.bf16.mxu1 %vm1606_vm0, %v1605_v0  ;;  %v1343_v10 = vld [vmem:[#allocation8 + $0x18] sm:$0xff]   ;;  %v1344_v11 = vld [vmem:[#allocation8 + $0x10] sm:$0xff]   ;;  %v1345_v22 = vld [vmem:[#allocation8 + $0x8] sm:$0xff]   ;;  %s475_s11 = scalar_lea.vmem [#allocation13], %s1119_s28  ;;  %s1154_s18 = sshll.u32 %s1686_s17, 8 }
  0x99   : > { %1180 = vmatpush3.bf16.msra.mxu0 %v1339_v1  ;;  %1186 = vmatpush3.bf16.msra.mxu1 %v1341_v3  ;;  %v1123_v12 = vld [vmem:[%s1997_s3] ss:$0 sm:$0xff]  ;;  %v1346_v23 = vld [vmem:[#allocation8] sm:$0xff]   ;;  %v1347_v39 = vld [vmem:[#allocation10 + $0x18] sm:$0xff]   ;;  %s965_s4 = sshll.u32 %s475_s11, 4  ;;  %s1951_s2 = scalar_lea.hbm %s2004_s10, %s1154_s18  ;;  %s1946_s4 = int_to_ptr.vmem [resolvable:$true] %s965_s4 }
  0x9a   : > { %1193 = vmatprep.subr.bf16.mxu0 %v1605_v0  ;;  %1187 = vmatprep.subr.bf16.mxu1 %v1605_v0  ;;  %v1128_v29 = vld [vmem:[%s1999_s5] ss:$0 sm:$0xff]  ;;  %v1349_v41 = vld [vmem:[#allocation10 + $0x8] sm:$0xff]   ;;  %v1350_v42 = vld [vmem:[#allocation10] sm:$0xff]   ;;  %s952_s6 = scalar_lea.sflag [#allocation4], %s1865_s0  ;;  %s1515_s21 = scalar_lea.vmem %s1946_s4, 256 }
  0x9b   : > { %v1348_v40 = vld [vmem:[#allocation10 + $0x10] sm:$0xff]   ;;  %v1351_v43 = vld [vmem:[#allocation11 + $0x18] sm:$0xff]   ;;  %v1353_v50 = vld [vmem:[#allocation11 + $0x8] sm:$0xff]   ;;  %p1516_p0 = scmp.ne.s32.totalorder %s1946_s4, %s1515_s21  ;;  %p2040_p11 = scmp.ne.s32.totalorder %s2027_s29, 0 }
  0x9c   : > { %1182 = vmatmul.mubr.msk.bf16.vlgmr.msra.gmra.mxu0 %vm499_vm1, %v1896_v2  ;;  %v1352_v44 = vld [vmem:[#allocation11 + $0x10] sm:$0xff]   ;;  %v1354_v51 = vld [vmem:[#allocation11] sm:$0xff]   ;;  %s1607_s17 = smov [#allocation13]  }
  0x9d   : > { %1195 = vmatprep.mubr.msk.bf16.mxu0 %vm1606_vm0, %v1605_v0  ;;  %1188 = vmatpush3.bf16.msra.mxu1 %v1342_v4  ;;  %v1135_v53 = vld [vmem:[%s2001_s7] ss:$0 sm:$0xff]  ;;  %p1517_p5 = pnand %p1516_p0, %p2040_p11  ;;  %s1519_s19 = sshll.u32 %s1607_s17, 4  ;;  %s1520_s19 = int_to_ptr.vmem [resolvable:$false] %s1519_s19 }
  0x9e   : > { %1199 = vmatprep.subr.bf16.mxu1 %v1605_v0  ;;  %v1141_v60 = vld [vmem:[%s2003_s9] ss:$0 sm:$0xff]  ;;  %s1521_s25 = scalar_lea.vmem %s1520_s19, 512  ;;  %p1522_p4 = scmp.lt.s32.totalorder %s1946_s4, %s1520_s19 }
  0x9f   : > { %p1518_p12 = pneg %p1517_p5  ;;  %p1523_p6 = scmp.lt.s32.totalorder %s1521_s25, %s1515_s21 }
  0xa1   : > { %p1524_p10 = por %p1523_p6, %p1522_p4 }
  0xa3   : > { %p1525_p3 = pnand %p1524_p10, %p1518_p12 }
 0x15c   : > { %v537_v5 = vpop.f32.mrf.mxu0 }
 0x15e   : > { %v1183_v6 = vpop.f32.mrf.mxu0 }
 0x160   : > { %v540_v7 = vpop.f32.mrf.mxu0 }
 0x161   : > { %v544_v8 = vpack.c.bf16 %v540_v7, %v537_v5 }
 0x162   : > { %v1184_v9 = vpop.f32.mrf.mxu0 }
 0x163   : > { %1190 = vmatmul.mubr.msk.bf16.vlgmr.msra.gmra.mxu1 %vm563_vm2, %v544_v8 }
 0x164   : > { %1207 = vmatprep.mubr.msk.bf16.mxu1 %vm1606_vm0, %v1605_v0  ;;  %1200 = vmatpush3.bf16.msra.mxu1 %v1343_v10 }
 0x165   : > { %1201 = vmatprep.subr.bf16.mxu1 %v1605_v0 }
 0x168   : > { %1202 = vmatpush3.bf16.msra.mxu1 %v1344_v11 }
 0x169   : > { %1203 = vmatprep.subr.bf16.mxu1 %v1605_v0 }
 0x16c   : > { %1204 = vmatpush3.bf16.msra.mxu1 %v1345_v22 }
 0x16d   : > { %1205 = vmatprep.subr.bf16.mxu1 %v1605_v0 }
 0x170   : > { %1206 = vmatpush3.bf16.msra.mxu1 %v1346_v23 }
 0x171   : > { %1229 = vmatprep.subr.bf16.mxu1 %v1605_v0 }
 0x223   : > { %v601_v13 = vpop.f32.mrf.mxu1 }
 0x224   : > { %v602_v15 = vadd.f32 %v1123_v12, %v601_v13 }
 0x225   : > { %v1191_v14 = vpop.f32.mrf.mxu1 }
 0x226   : > { %v608_v19 = vmax.f32 %v602_v15, 0.0 }
 0x227   : > { %v604_v16 = vpop.f32.mrf.mxu1 }
 0x228   : > { %v605_v17 = vadd.f32 %v1123_v12, %v604_v16 }
 0x229   : > { %v1192_v18 = vpop.f32.mrf.mxu1 }
 0x22a   : > { %v609_v20 = vmax.f32 %v605_v17, 0.0 }
 0x22c   : > { %v610_v21 = vpack.c.bf16 %v609_v20, %v608_v19 }
 0x22e   : > { %1194 = vmatpush3.bf16.msra.mxu0 %v610_v21 }
 0x22f   : > { %1211 = vmatprep.subr.bf16.mxu0 %v1605_v0 }
 0x231   : > { %1196 = vmatmul.mubr.msk.bf16.vlgmr.msra.gmra.mxu0 %vm499_vm1, %v1896_v2 }
 0x232   : > { %1213 = vmatprep.mubr.msk.bf16.mxu0 %vm1606_vm0, %v1605_v0 }
 0x2f1   : > { %v654_v24 = vpop.f32.mrf.mxu0 }
 0x2f3   : > { %v1197_v25 = vpop.f32.mrf.mxu0 }
 0x2f5   : > { %v657_v26 = vpop.f32.mrf.mxu0 }
 0x2f6   : > { %v661_v27 = vpack.c.bf16 %v657_v26, %v654_v24 }
 0x2f7   : > { %v1198_v28 = vpop.f32.mrf.mxu0 }
 0x2f8   : > { %1208 = vmatmul.mubr.msk.bf16.vlgmr.msra.gmra.mxu1 %vm692_vm3, %v661_v27 }
 0x2f9   : > { %1237 = vmatprep.mubr.msk.bf16.mxu1 %vm1606_vm0, %v1605_v0  ;;  %1230 = vmatpush3.bf16.msra.mxu1 %v1351_v43 }
 0x2fa   : > { %1231 = vmatprep.subr.bf16.mxu1 %v1605_v0 }
 0x2fd   : > { %1232 = vmatpush3.bf16.msra.mxu1 %v1352_v44 }
 0x2fe   : > { %1233 = vmatprep.subr.bf16.mxu1 %v1605_v0 }
 0x301   : > { %1234 = vmatpush3.bf16.msra.mxu1 %v1353_v50 }
 0x302   : > { %1235 = vmatprep.subr.bf16.mxu1 %v1605_v0 }
 0x305   : > { %1236 = vmatpush3.bf16.msra.mxu1 %v1354_v51 }
 0x3b8   : > { %v730_v30 = vpop.f32.mrf.mxu1 }
 0x3b9   : > { %v731_v32 = vadd.f32 %v1128_v29, %v730_v30 }
 0x3ba   : > { %v1209_v31 = vpop.f32.mrf.mxu1 }
 0x3bb   : > { %v737_v36 = vmax.f32 %v731_v32, 0.0 }
 0x3bc   : > { %v733_v33 = vpop.f32.mrf.mxu1 }
 0x3bd   : > { %v734_v34 = vadd.f32 %v1128_v29, %v733_v33 }
 0x3be   : > { %v1210_v35 = vpop.f32.mrf.mxu1 }
 0x3bf   : > { %v738_v37 = vmax.f32 %v734_v34, 0.0 }
 0x3c1   : > { %v739_v38 = vpack.c.bf16 %v738_v37, %v737_v36 }
 0x3c3   : > { %1212 = vmatpush3.bf16.msra.mxu0 %v739_v38 }
 0x3c4   : > { %1217 = vmatprep.subr.bf16.mxu0 %v1605_v0 }
 0x3c6   : > { %1214 = vmatmul.mubr.msk.bf16.vlgmr.msra.gmra.mxu0 %vm499_vm1, %v1896_v2 }
 0x3c7   : > { %1218 = vmatpush3.bf16.msra.mxu0 %v1347_v39  ;;  %1225 = vmatprep.mubr.msk.bf16.mxu0 %vm1606_vm0, %v1605_v0 }
 0x3c8   : > { %1219 = vmatprep.subr.bf16.mxu0 %v1605_v0 }
 0x3cb   : > { %1220 = vmatpush3.bf16.msra.mxu0 %v1348_v40 }
 0x3cc   : > { %1221 = vmatprep.subr.bf16.mxu0 %v1605_v0 }
 0x3cf   : > { %1222 = vmatpush3.bf16.msra.mxu0 %v1349_v41 }
 0x3d0   : > { %1223 = vmatprep.subr.bf16.mxu0 %v1605_v0 }
 0x3d3   : > { %1224 = vmatpush3.bf16.msra.mxu0 %v1350_v42 }
 0x486   : > { %v783_v45 = vpop.f32.mrf.mxu0 }
 0x488   : > { %v1215_v46 = vpop.f32.mrf.mxu0 }
 0x48a   : > { %v786_v47 = vpop.f32.mrf.mxu0 }
 0x48b   : > { %v790_v48 = vpack.c.bf16 %v786_v47, %v783_v45 }
 0x48c   : > { %v1216_v49 = vpop.f32.mrf.mxu0 }
 0x48d   : > { %1226 = vmatmul.mubr.msk.bf16.vlgmr.msra.gmra.mxu0 %vm692_vm3, %v790_v48 }
 0x54d   : > { %v858_v52 = vpop.f32.mrf.mxu0 }
 0x54e   : > { %v859_v56 = vadd.f32 %v1135_v53, %v858_v52 }
 0x54f   : > { %v1227_v54 = vpop.f32.mrf.mxu0 }
 0x551   : > { %v861_v55 = vpop.f32.mrf.mxu0 }
 0x552   : > { %v862_v57 = vadd.f32 %v1135_v53, %v861_v55 }
 0x553   : > { %v1228_v58 = vpop.f32.mrf.mxu0 }
 0x554   : > { %v865_v59 = vpack.c.bf16 %v862_v57, %v859_v56 }
 0x556   : > { %1238 = vmatmul.mubr.msk.bf16.vlgmr.msra.gmra.mxu1 %vm692_vm3, %v865_v59 }
 0x616   : > { %v942_v61 = vpop.f32.mrf.mxu1 }
 0x617   : > { %v943_v62 = vadd.f32 %v1141_v60, %v942_v61 }
 0x618   : > { %v1239_v63 = vpop.f32.mrf.mxu1 }
 0x619   : > { %949 = vst [vmem:[%s475_s11] sm:$0xff] %v943_v62 }
 0x61a   : > { %v945_v0 = vpop.f32.mrf.mxu1 }
 0x61b   : > { %v946_v1 = vadd.f32 %v1141_v60, %v945_v0 }
 0x61c   : > { %v1240_v2 = vpop.f32.mrf.mxu1 }
 0x61d   : > { %950 = vst [vmem:[%s475_s11 + $0x8] sm:$0xff] %v946_v1 }
 0x61e   : > { %1528 = shalt.err (!%p1525_p3)
}
 0x61f   : > { %s1529_s12 = scalar_lea.hbm %s1951_s2, 256  ;;  %s1533_s22 = scalar_lea.hbm %s2004_s10, 512 }
 0x620   : > { %p1530_p8 = scmp.ne.s32.totalorder %s1951_s2, %s1529_s12  ;;  %p1534_p7 = scmp.lt.s32.totalorder %s1951_s2, %s2004_s10 }
 0x621   : > { %p1535_p1 = scmp.lt.s32.totalorder %s1533_s22, %s1529_s12 }
 0x622   : > { %p1531_p2 = pnand %p1530_p8, %p2040_p11 }
 0x623   : > { %p1536_p13 = por %p1535_p1, %p1534_p7 }
 0x624   : > { %p1532_p9 = pneg %p1531_p2 }
 0x626   : > { %p1537_p0 = pnand %p1536_p13, %p1532_p9 }
 0x628   : > { %1540 = shalt.err (!%p1537_p0)
}
 0x629   : > { %s1608_s30 = smov 128   ;;  %s1609_s11 = smov 8  }
 0x62a   : > { %1261 = dma.vmem_to_hbm [thread:$0]  (%p2040_p11), %s1946_s4, 256, %s1951_s2, %s952_s6, %s1608_s30, %s1608_s30, %s1609_s11  }
 0x62b PF: > { %s980_s18 = sand.u32 1, %s1583_s13   ;;  %p2041_p5 = scmp.ne.s32.totalorder %s2020_s20, 0 }
 0x62c   : > { %p2042_p12 = scmp.ge.s32.totalorder %s1595_s16, 2  ;;  %s981_s26 = scalar_lea.sflag [#allocation4], %s980_s18 }
 0x62e   : > { %p1284_p4 = pnand %p2042_p12, %p2041_p5 }
 0x630   : > { %p1285_p6 = pneg %p1284_p4 }
 0x632   : > { %1578 = dma.done.wait (%p1285_p6), %s981_s26, 256  }
 0x633   : > { %1580 = vsyncadd (%p1285_p6), %s981_s26, 4294967040  ;;  %s2043_s15 = sld [smem:[#allocation20_spill]]  ;;  %p28_p10 = scmp.ge.s32.totalorder %s1765_s27, 4  }
 0x634   : > { %s2044_s21 = sld [smem:[#allocation21_spill]]  ;;  %s2045_s13 = smov %s1587_s14 }
 0x635   : > { %s2048_s16 = smov %s1765_s27 }
 0x636   :  { %30 = sbr.rel (!%p28_p10) target bundleno = 15 (0xf), region = 134 }
 0x639   : > { %s2046_s14 = smov %s2043_s15 }
 0x63a   : > { %s2047_s15 = smov %s2044_s21 }
 0x63b   :  { %986 = vsyncpa [#allocation3], 1 }
 0x63c   :  { %988 = vsyncpa [#allocation3 + $0x1], 1 }
 0x63d   :  { %989 = vsyncpa [#allocation6], 1 }
 0x63e   :  { %991 = vsyncpa [#allocation6 + $0x1], 1 }
 0x63f   :  { %992 = vsyncpa [#allocation9], 1 }
 0x640   :  { %993 = vsyncpa [#allocation12], 1 }
 0x641   :  { %994 = vsyncpa [#allocation4], 1 }
 0x642   :  { %996 = vsyncpa [#allocation4 + $0x1], 1 }

</bundles_post_ra>
